<compile_context>
chip_gen: v6e
topology: v6e:2x2x1
jax: 0.10.0
libtpu: 0.0.40
codegen_flags: <defaults>
</compile_context>

<pallas_src>
import math
import functools

import jax
import jax.numpy as jnp
from jax.experimental import pallas as pl
from jax.experimental.pallas import tpu as pltpu


def make_pe_table(d_model, max_len=5000, dtype=jnp.float32):
    """Sinusoidal table, built exactly like the PyTorch registered buffer."""
    position = jnp.arange(max_len, dtype=jnp.float32)[:, None]
    div_term = jnp.exp(
        jnp.arange(0, d_model, 2, dtype=jnp.float32) * -(math.log(10000.0) / d_model)
    )
    pe = jnp.zeros((max_len, d_model), dtype=jnp.float32)
    pe = pe.at[:, 0::2].set(jnp.sin(position * div_term))
    pe = pe.at[:, 1::2].set(jnp.cos(position * div_term))
    return pe.astype(dtype)


def _pe_add_kernel(x_ref, pe_ref, o_ref, *, batch):
    # x_ref / o_ref block: (tile_seq, batch * d_model)   — lane-dense slab.
    # pe_ref block:        (tile_seq, d_model)           — f32 table rows.
    pe = pe_ref[...]
    if batch > 1:
        pe = jnp.tile(pe, (1, batch))  # lane b*D + d  <-  pe[row, d]
    o_ref[...] = (x_ref[...].astype(jnp.float32) + pe).astype(o_ref.dtype)


def _pick_tile_seq(seq_len, row_bytes, target_block_bytes):
    """Rows per block: ~target bytes, multiple of 8 sublanes, >=2 grid steps
    when the sequence allows it (dual-TC on v7x), preferring a divisor of S."""
    if seq_len <= 8:
        return seq_len
    target = max(8, (target_block_bytes // max(row_bytes, 1)) // 8 * 8)
    if seq_len >= 16:
        # Force at least 2 grid steps so dimension_semantics=("parallel",)
        # can shard across both v7x TensorCores.
        half = max(8, (pl.cdiv(seq_len, 2) // 8) * 8)
        target = min(target, half)
    target = min(target, seq_len)
    if target == seq_len or seq_len % target == 0:
        return target
    if seq_len % 8 == 0:
        # Prefer a nearby multiple of 8 that divides S: no masked tail block.
        for cand in range(target, max(8, target // 2) - 1, -8):
            if seq_len % cand == 0:
                return cand
    return target


def positional_encoding(x, pe_table=None, *, max_len=5000,
                        target_block_bytes=4 << 20):
    """x: (seq_len, batch, d_model). Returns x + pe[:seq_len] (eval-mode dropout)."""
    S, B, D = x.shape
    assert S <= max_len, "sequence longer than positional-encoding table"
    BD = B * D

    if pe_table is None:
        pe_table = make_pe_table(D, max_len=max_len)
    pe = pe_table[:S].astype(jnp.float32)  # (S, D)

    # Row-major (S, B, D) and (S, B*D) share the same memory layout: the
    # reshape is free and makes the kernel's store path lane-dense.
    x_flat = x.reshape(S, BD)

    row_bytes = BD * x.dtype.itemsize
    tile_seq = _pick_tile_seq(S, row_bytes, target_block_bytes)
    grid = (pl.cdiv(S, tile_seq),)

    # VMEM budget: double-buffered x-in, pe-in and out blocks, plus headroom.
    block_x_bytes = tile_seq * BD * x.dtype.itemsize
    block_pe_bytes = tile_seq * D * 4
    needed = 2 * (2 * block_x_bytes + block_pe_bytes) + (2 << 20)
    vmem_limit = int(min(max(needed, 16 << 20), 32 << 20))

    kernel = functools.partial(_pe_add_kernel, batch=B)

    out_flat = pl.pallas_call(
        kernel,
        out_shape=jax.ShapeDtypeStruct((S, BD), x.dtype),
        grid_spec=pltpu.PrefetchScalarGridSpec(
            num_scalar_prefetch=0,
            grid=grid,
            in_specs=[
                pl.BlockSpec((tile_seq, BD), lambda i: (i, 0)),
                pl.BlockSpec((tile_seq, D), lambda i: (i, 0)),
            ],
            out_specs=pl.BlockSpec((tile_seq, BD), lambda i: (i, 0)),
        ),
        compiler_params=pltpu.CompilerParams(
            dimension_semantics=("parallel",),
            vmem_limit_bytes=vmem_limit,
        ),
        input_output_aliases={0: 0},
    )(x_flat, pe)

    # nn.Dropout(p=0.1) is identity in eval mode; reproduced here as identity.
    # TODO(synk): training-mode stochastic dropout (pltpu.prng_seed +
    #             pltpu.prng_random_bits inside the kernel).
    return out_flat.reshape(S, B, D)


def _reference(x, max_len=5000):
    """Pure-JAX reference mirroring the PyTorch module (eval mode)."""
    S, B, D = x.shape
    pe = make_pe_table(D, max_len=max_len)[:, None, :]  # (max_len, 1, d_model)
    return x + pe[:S]


if __name__ == "__main__":
    key = jax.random.PRNGKey(0)

    # Primary small example consistent with the module: (seq, batch, d_model).
    seq, batch, d_model = 8, 2, 32
    x = jax.random.normal(key, (seq, batch, d_model), dtype=jnp.float32)

    y = positional_encoding(x)
    y = jax.block_until_ready(y)
    y_ref = _reference(x)
    assert jnp.allclose(y, y_ref, atol=1e-6, rtol=1e-6), "mismatch vs reference"

    # Secondary check: multi-block grid with a 128-multiple lane width.
    key2 = jax.random.PRNGKey(1)
    x2 = jax.random.normal(key2, (64, 2, 64), dtype=jnp.float32)
    y2 = jax.block_until_ready(
        positional_encoding(x2, target_block_bytes=16 * 1024)
    )
    assert jnp.allclose(y2, _reference(x2), atol=1e-6, rtol=1e-6), "mismatch (multi-block)"

    print("KERNEL_OK")
</pallas_src>

<mosaic_0001>
module attributes {stable_mosaic.version = 11 : i64} {
  func.func @_pe_add_kernel(%arg0: i32, %arg1: memref<8x64xf32, #tpu.memory_space<vmem>>, %arg2: memref<8x32xf32, #tpu.memory_space<vmem>>, %arg3: memref<8x64xf32, #tpu.memory_space<vmem>>) attributes {dimension_semantics = [#tpu.dimension_semantics<parallel>], iteration_bounds = array<i64: 1>, scalar_prefetch = 0 : i64, scratch_operands = 0 : i64, tpu.core_type = #tpu.core_type<tc>, window_params = [{transform_indices = @transform_0, window_bounds = array<i64: 8, 64>}, {transform_indices = @transform_1, window_bounds = array<i64: 8, 32>}, {transform_indices = @transform_2, window_bounds = array<i64: 8, 64>}]} {
    %c0 = arith.constant 0 : index
    %c0_0 = arith.constant 0 : index
    %0 = vector.load %arg2[%c0, %c0_0] : memref<8x32xf32, #tpu.memory_space<vmem>>, vector<8x32xf32>
    %1 = tpu.concatenate %0, %0 in 1 : vector<8x32xf32>, vector<8x32xf32> -> vector<8x64xf32>
    %c0_1 = arith.constant 0 : index
    %c0_2 = arith.constant 0 : index
    %2 = vector.load %arg1[%c0_1, %c0_2] : memref<8x64xf32, #tpu.memory_space<vmem>>, vector<8x64xf32>
    %3 = arith.addf %2, %1 : vector<8x64xf32>
    %c0_3 = arith.constant 0 : index
    %c0_4 = arith.constant 0 : index
    %4 = vector.load %arg3[%c0_3, %c0_4] : memref<8x64xf32, #tpu.memory_space<vmem>>, vector<8x64xf32>
    tpu.vector_store %arg3[%c0_3, %c0_4], %3 {strides = array<i32>} : memref<8x64xf32, #tpu.memory_space<vmem>>, vector<8x64xf32>,
    return
  }
  func.func @transform_0(%arg0: i32) -> (i32, i32) {
    %c0_i32 = arith.constant 0 : i32
    %c0_i32_0 = arith.constant 0 : i32
    return %arg0, %c0_i32 : i32, i32
  }
  func.func @transform_1(%arg0: i32) -> (i32, i32) {
    %c0_i32 = arith.constant 0 : i32
    %c0_i32_0 = arith.constant 0 : i32
    return %arg0, %c0_i32 : i32, i32
  }
  func.func @transform_2(%arg0: i32) -> (i32, i32) {
    %c0_i32 = arith.constant 0 : i32
    %c0_i32_0 = arith.constant 0 : i32
    return %arg0, %c0_i32 : i32, i32
  }
}

</mosaic_0001>

<bundles_post_ra>
// kernel: tpu_custom_call.1
= control target key start
LH: loop header
LB: loop body
LE: loop exit
PB: predicated region body
PF: predicated region fallthrough
CT: control target
= control target key end

     0   :  { %7 = vsyncpa [#allocation3], 0  ;;  %s124_s0 = inlined_call_operand.hbm [shape: f32[8,64], index: 0, kind: input, shape index: {}, may-alias: {0,2}]   ;;  %s125_s1 = inlined_call_operand.vmem [shape: f32[8,32], index: 1, kind: input, shape index: {}]   ;;  %s126_s2 = inlined_call_operand.hbm [shape: f32[8,64], index: 2, kind: output, shape index: {}, may-alias: {0,2}]  }
   0x1   :  { %8 = vsyncpa [#allocation4], 0  ;;  %s97_s9 = smov [#allocation2]  }
   0x2   :  { %s15_s10 = sshll.u32 %s97_s9, 4  ;;  %s16_s10 = int_to_ptr.vmem [resolvable:$true] %s15_s10 }
   0x3   :  { %s61_s11 = scalar_lea.vmem %s16_s10, 128  ;;  %p66_p1 = scmp.lt.s32.totalorder %s16_s10, %s16_s10 }
   0x4   :  { %p62_p0 = scmp.ne.s32.totalorder %s16_s10, %s61_s11  ;;  %p67_p2 = scmp.lt.s32.totalorder %s61_s11, %s61_s11 }
   0x6   :  { %p68_p3 = por %p67_p2, %p66_p1 }
   0x8   :  { %p69_p4 = pnand %p68_p3, %p62_p0 }
   0xa   :  { %72 = shalt.err (!%p69_p4)
}
   0xb   :  { %18 = dma.hbm_to_vmem [thread:$0]  %s124_s0, 128, %s16_s10, [#allocation3]  }
   0xc   :  { %93 = dma.done.wait [#allocation3], 128  }
   0xd   :  { %94 = vsyncadd [#allocation3], 4294967168  ;;  %v24_v0 = vld [vmem:[%s125_s1] sm:$0xff]  ;;  %s98_s16 = smov 32   ;;  %vm29_vm0 = vcmask 261120   ;;  %s99_s17 = smov [#allocation5]  }
   0xe   :  { %26 = vrot.lane.b32.xlu0 %v24_v0, %s98_s16  ;;  %v31_v1 = vld [vmem:[#allocation2] sm:$0xff]  ;;  %s41_s18 = sshll.u32 %s99_s17, 4  ;;  %vm33_vm1 = vcmask 523264   ;;  %s42_s18 = int_to_ptr.vmem [resolvable:$true] %s41_s18 }
   0xf   :  { %s73_s19 = scalar_lea.vmem %s42_s18, 128  ;;  %p78_p6 = scmp.lt.s32.totalorder %s42_s18, %s42_s18 }
  0x10   :  { %p74_p5 = scmp.ne.s32.totalorder %s42_s18, %s73_s19  ;;  %p79_p7 = scmp.lt.s32.totalorder %s73_s19, %s73_s19 }
  0x12   :  { %p80_p8 = por %p79_p7, %p78_p6 }
  0x14   :  { %p81_p9 = pnand %p80_p8, %p74_p5 }
  0x80   :  { %v27_v2 = vpop.permute.xlu0 %26 }
  0x81   :  { %v30_v3 = vsel %vm29_vm0, %v24_v0, %v27_v2 }
  0x82   :  { %v32_v4 = vadd.f32 %v31_v1, %v30_v3 }
  0x84   :  { %34 = vst.msk [vmem:[#allocation5] sm:$0xff] %vm33_vm1, %v32_v4 }
  0x85   :  { %84 = shalt.err (!%p81_p9)
}
  0x86   :  { %44 = dma.vmem_to_hbm [thread:$0]  %s42_s18, 128, %s126_s2, [#allocation4]  }
  0x87   :  { %95 = dma.done.wait [#allocation4], 128  }
  0x88   :  { %96 = vsyncadd [#allocation4], 4294967168 }
  0x89   :  { %48 = vsyncpa [#allocation3], 1 }
  0x8a   :  { %49 = vsyncpa [#allocation4], 1 }

</bundles_post_ra>
